<compile_context>
chip_gen: v7x
topology: tpu7x:2x2x1
jax: 0.10.0
libtpu: 0.0.40
codegen_flags: <defaults>
</compile_context>

<pallas_src>
import math
import functools

import jax
import jax.numpy as jnp
from jax import lax
from jax.experimental import pallas as pl
from jax.experimental.pallas import tpu as pltpu

EPS = 1e-5
LANE = 128
SUBLANE = 8


def _round_up(x, m):
    return (x + m - 1) // m * m


# --------------------- Pass 1: conv matmul + partial BN stats ----------------

def _conv_stats_kernel(patches_ref, w_ref, y_ref, stats_ref):
    # patches_ref: (TM, Kp) bf16   w_ref: (Kp, Cp) bf16
    # y_ref:       (TM, Cp) f32    stats_ref: (8, Cp) f32  (row0=sum, row1=sumsq)
    y = jnp.dot(patches_ref[...], w_ref[...], preferred_element_type=jnp.float32)
    y_ref[...] = y
    s = jnp.sum(y, axis=0, keepdims=True)           # (1, Cp)
    ss = jnp.sum(y * y, axis=0, keepdims=True)      # (1, Cp)
    pad = jnp.zeros((SUBLANE - 2, y.shape[1]), jnp.float32)
    stats_ref[...] = jnp.concatenate([s, ss, pad], axis=0)


# --------------------- Pass 2: BN affine + ReLU ------------------------------

def _bn_relu_kernel(y_ref, scale_ref, shift_ref, o_ref):
    # y_ref: (TM, Cp) f32, scale/shift: (1, Cp) f32 (pre-folded BN + affine)
    o_ref[...] = jnp.maximum(y_ref[...] * scale_ref[...] + shift_ref[...], 0.0)


# --------------------- im2col glue (wrapper-side) ----------------------------

def _im2col_3d(x, k, stride, padding):
    """x: (N, Cin, D, H, W) -> (N*Do*Ho*Wo, Cin*k*k*k), plus output spatial dims."""
    N, C, D, H, W = x.shape
    p = padding
    xp = jnp.pad(x, ((0, 0), (0, 0), (p, p), (p, p), (p, p)))
    Do = (D + 2 * p - k) // stride + 1
    Ho = (H + 2 * p - k) // stride + 1
    Wo = (W + 2 * p - k) // stride + 1
    cols = []
    for kd in range(k):
        for kh in range(k):
            for kw in range(k):
                patch = xp[:, :,
                           kd:kd + Do * stride:stride,
                           kh:kh + Ho * stride:stride,
                           kw:kw + Wo * stride:stride]
                cols.append(patch)
    # (k^3, N, C, Do, Ho, Wo) -> (N, Do, Ho, Wo, C, k^3)
    cols = jnp.stack(cols, axis=0).transpose(1, 3, 4, 5, 2, 0)
    return cols.reshape(N * Do * Ho * Wo, C * k * k * k), (N, Do, Ho, Wo)


# --------------------- Forward wrapper ---------------------------------------

def basic_conv_forward(x, weight, gamma, beta, *, kernel_size, stride=1,
                       padding=0, row_tile=512):
    """Fused Conv3d(bias=False) + BatchNorm3d(training-mode) + ReLU.

    x: (N, Cin, D, H, W)  weight: (Cout, Cin, k, k, k)  gamma/beta: (Cout,)
    Returns (N, Cout, Do, Ho, Wo) float32.
    """
    Cout = weight.shape[0]
    patches, (N, Do, Ho, Wo) = _im2col_3d(x, kernel_size, stride, padding)
    M, K = patches.shape

    TM = min(_round_up(row_tile, SUBLANE), _round_up(M, SUBLANE))
    Mp = _round_up(M, TM)
    Kp = _round_up(K, LANE)
    Cp = _round_up(Cout, LANE)
    n_tiles = Mp // TM

    # bf16 MXU inputs (halves the dominant HBM stream); f32 accumulation.
    patches_p = jnp.pad(patches.astype(jnp.float32),
                        ((0, Mp - M), (0, Kp - K))).astype(jnp.bfloat16)
    w_p = jnp.pad(weight.reshape(Cout, K).T.astype(jnp.float32),
                  ((0, Kp - K), (0, Cp - Cout))).astype(jnp.bfloat16)

    cparams = pltpu.CompilerParams(
        dimension_semantics=("parallel",),
        vmem_limit_bytes=32 * 1024 * 1024,
    )
    cost1 = pl.CostEstimate(
        flops=2 * Mp * Kp * Cp,
        transcendentals=0,
        bytes_accessed=(patches_p.size * 2 + w_p.size * 2
                        + Mp * Cp * 4 + n_tiles * SUBLANE * Cp * 4),
    )

    # Pass 1: conv matmul (MXU) + per-tile partial BN statistics.
    y, stats = pl.pallas_call(
        _conv_stats_kernel,
        out_shape=(jax.ShapeDtypeStruct((Mp, Cp), jnp.float32),
                   jax.ShapeDtypeStruct((n_tiles * SUBLANE, Cp), jnp.float32)),
        grid=(n_tiles,),
        in_specs=[
            pl.BlockSpec((TM, Kp), lambda i: (i, 0)),
            pl.BlockSpec((Kp, Cp), lambda i: (0, 0)),
        ],
        out_specs=(
            pl.BlockSpec((TM, Cp), lambda i: (i, 0)),
            pl.BlockSpec((SUBLANE, Cp), lambda i: (i, 0)),
        ),
        compiler_params=cparams,
        cost_estimate=cost1,
    )(patches_p, w_p)

    # Tiny cross-tile stats reduction (padded rows are all-zero -> divide by true M).
    stats = stats.reshape(n_tiles, SUBLANE, Cp)
    ch_sum = jnp.sum(stats[:, 0, :], axis=0)                 # (Cp,)
    ch_ssq = jnp.sum(stats[:, 1, :], axis=0)                 # (Cp,)
    mean = ch_sum / M
    var = jnp.maximum(ch_ssq / M - mean * mean, 0.0)         # biased (train-mode) var
    gamma_p = jnp.pad(gamma.astype(jnp.float32), (0, Cp - Cout))
    beta_p = jnp.pad(beta.astype(jnp.float32), (0, Cp - Cout))
    scale = gamma_p * lax.rsqrt(var + EPS)
    shift = beta_p - mean * scale

    # Pass 2: normalize + affine + ReLU, lane-dense stores.
    out = pl.pallas_call(
        _bn_relu_kernel,
        out_shape=jax.ShapeDtypeStruct((Mp, Cp), jnp.float32),
        grid=(n_tiles,),
        in_specs=[
            pl.BlockSpec((TM, Cp), lambda i: (i, 0)),
            pl.BlockSpec((1, Cp), lambda i: (0, 0)),
            pl.BlockSpec((1, Cp), lambda i: (0, 0)),
        ],
        out_specs=pl.BlockSpec((TM, Cp), lambda i: (i, 0)),
        compiler_params=cparams,
    )(y, scale.reshape(1, Cp), shift.reshape(1, Cp))

    # (Mp, Cp) -> slice real rows/channels -> (N, Do, Ho, Wo, Cout) -> NCDHW
    return out[:M, :Cout].reshape(N, Do, Ho, Wo, Cout).transpose(0, 4, 1, 2, 3)


# --------------------- Reference + test --------------------------------------

def _reference(x, weight, gamma, beta, *, kernel_size, stride, padding):
    """Pure-JAX reference: conv (bf16 inputs / f32 accum, mirroring the kernel's
    MXU precision) + training-mode BN + ReLU."""
    y = lax.conv_general_dilated(
        x.astype(jnp.bfloat16), weight.astype(jnp.bfloat16),
        window_strides=(stride,) * 3,
        padding=[(padding, padding)] * 3,
        dimension_numbers=("NCDHW", "OIDHW", "NCDHW"),
        preferred_element_type=jnp.float32)
    mean = jnp.mean(y, axis=(0, 2, 3, 4), keepdims=True)
    var = jnp.mean((y - mean) ** 2, axis=(0, 2, 3, 4), keepdims=True)
    y = (y - mean) * lax.rsqrt(var + EPS)
    y = y * gamma.reshape(1, -1, 1, 1, 1) + beta.reshape(1, -1, 1, 1, 1)
    return jnp.maximum(y, 0.0)


if __name__ == "__main__":
    # BasicConv(in_planes=4, out_planes=8, kernel_size=3, stride=1, padding=1,
    #           relu=True, bn=True, bias=False)
    N, Cin, D, H, W = 2, 4, 8, 8, 8
    Cout, k, stride, padding = 8, 3, 1, 1

    key = jax.random.PRNGKey(0)
    kx, kw = jax.random.split(key)

    x = jax.random.normal(kx, (N, Cin, D, H, W), dtype=jnp.float32)

    # Conv3d default init: kaiming_uniform(a=sqrt(5)) -> U(-1/sqrt(fan_in), 1/sqrt(fan_in))
    fan_in = Cin * k * k * k
    bound = 1.0 / math.sqrt(fan_in)
    weight = jax.random.uniform(kw, (Cout, Cin, k, k, k),
                                minval=-bound, maxval=bound, dtype=jnp.float32)
    # BatchNorm3d affine init: weight=1, bias=0
    gamma = jnp.ones((Cout,), dtype=jnp.float32)
    beta = jnp.zeros((Cout,), dtype=jnp.float32)
    # TODO(synk): BN running-stat (momentum=0.01) buffer updates are training
    # side effects and do not affect the forward output; not reproduced here.

    fwd = jax.jit(functools.partial(basic_conv_forward,
                                    kernel_size=k, stride=stride, padding=padding))
    out = jax.block_until_ready(fwd(x, weight, gamma, beta))

    ref = _reference(x, weight, gamma, beta,
                     kernel_size=k, stride=stride, padding=padding)
    assert out.shape == (N, Cout, D, H, W), out.shape
    # Tolerance reflects bf16 MXU inputs (matched in the reference).
    assert jnp.allclose(out, ref, atol=5e-3, rtol=5e-3), \
        float(jnp.max(jnp.abs(out - ref)))

    print("KERNEL_OK")
</pallas_src>

<mosaic_0001>
module attributes {stable_mosaic.version = 11 : i64} {
  func.func @_conv_stats_kernel(%arg0: i32, %arg1: memref<512x128xbf16, #tpu.memory_space<vmem>>, %arg2: memref<128x128xbf16, #tpu.memory_space<vmem>>, %arg3: memref<512x128xf32, #tpu.memory_space<vmem>>, %arg4: memref<8x128xf32, #tpu.memory_space<vmem>>) attributes {dimension_semantics = [#tpu.dimension_semantics<parallel>], iteration_bounds = array<i64: 2>, scalar_prefetch = 0 : i64, scratch_operands = 0 : i64, tpu.core_type = #tpu.core_type<tc>, window_params = [{transform_indices = @transform_0, window_bounds = array<i64: 512, 128>}, {pipeline_mode = #tpu.pipeline_mode<synchronous>, transform_indices = @transform_1, window_bounds = array<i64: 128, 128>}, {transform_indices = @transform_2, window_bounds = array<i64: 512, 128>}, {transform_indices = @transform_3, window_bounds = array<i64: 8, 128>}]} {
    %c0 = arith.constant 0 : index
    %c0_0 = arith.constant 0 : index
    %0 = vector.load %arg1[%c0, %c0_0] : memref<512x128xbf16, #tpu.memory_space<vmem>>, vector<512x128xbf16>
    %c0_1 = arith.constant 0 : index
    %c0_2 = arith.constant 0 : index
    %1 = vector.load %arg2[%c0_1, %c0_2] : memref<128x128xbf16, #tpu.memory_space<vmem>>, vector<128x128xbf16>
    %cst = arith.constant dense<0.000000e+00> : vector<512x128xf32>
    %2 = tpu.matmul %0, %1, %cst {dimension_numbers = #tpu.dot_dimension_numbers<[1], [0], [0], [1], [0, 0, 1, 1], [], []>} : vector<512x128xbf16>, vector<128x128xbf16>, vector<512x128xf32> -> vector<512x128xf32>
    %c0_3 = arith.constant 0 : index
    %c0_4 = arith.constant 0 : index
    %3 = vector.load %arg3[%c0_3, %c0_4] : memref<512x128xf32, #tpu.memory_space<vmem>>, vector<512x128xf32>
    tpu.vector_store %arg3[%c0_3, %c0_4], %2 {strides = array<i32>} : memref<512x128xf32, #tpu.memory_space<vmem>>, vector<512x128xf32>,
    %cst_5 = arith.constant dense<0.000000e+00> : vector<128xf32>
    %4 = vector.multi_reduction <add>, %2, %cst_5 [0] : vector<512x128xf32> to vector<128xf32>
    %5 = vector.shape_cast %4 : vector<128xf32> to vector<1x128xf32>
    %6 = arith.mulf %2, %2 : vector<512x128xf32>
    %cst_6 = arith.constant dense<0.000000e+00> : vector<128xf32>
    %7 = vector.multi_reduction <add>, %6, %cst_6 [0] : vector<512x128xf32> to vector<128xf32>
    %8 = vector.shape_cast %7 : vector<128xf32> to vector<1x128xf32>
    %cst_7 = arith.constant 0.000000e+00 : f32
    %9 = vector.broadcast %cst_7 : f32 to vector<6x128xf32>
    %10 = tpu.concatenate %5, %8, %9 in 0 : vector<1x128xf32>, vector<1x128xf32>, vector<6x128xf32> -> vector<8x128xf32>
    %c0_8 = arith.constant 0 : index
    %c0_9 = arith.constant 0 : index
    %11 = vector.load %arg4[%c0_8, %c0_9] : memref<8x128xf32, #tpu.memory_space<vmem>>, vector<8x128xf32>
    tpu.vector_store %arg4[%c0_8, %c0_9], %10 {strides = array<i32>} : memref<8x128xf32, #tpu.memory_space<vmem>>, vector<8x128xf32>,
    return
  }
  func.func @transform_0(%arg0: i32) -> (i32, i32) {
    %c0_i32 = arith.constant 0 : i32
    %c0_i32_0 = arith.constant 0 : i32
    return %arg0, %c0_i32 : i32, i32
  }
  func.func @transform_1(%arg0: i32) -> (i32, i32) {
    %c0_i32 = arith.constant 0 : i32
    %c0_i32_0 = arith.constant 0 : i32
    %c0_i32_1 = arith.constant 0 : i32
    return %c0_i32, %c0_i32_0 : i32, i32
  }
  func.func @transform_2(%arg0: i32) -> (i32, i32) {
    %c0_i32 = arith.constant 0 : i32
    %c0_i32_0 = arith.constant 0 : i32
    return %arg0, %c0_i32 : i32, i32
  }
  func.func @transform_3(%arg0: i32) -> (i32, i32) {
    %c0_i32 = arith.constant 0 : i32
    %c0_i32_0 = arith.constant 0 : i32
    return %arg0, %c0_i32 : i32, i32
  }
}

module attributes {stable_mosaic.version = 11 : i64} {
  func.func @_bn_relu_kernel(%arg0: i32, %arg1: memref<512x128xf32, #tpu.memory_space<vmem>>, %arg2: memref<1x128xf32, #tpu.memory_space<vmem>>, %arg3: memref<1x128xf32, #tpu.memory_space<vmem>>, %arg4: memref<512x128xf32, #tpu.memory_space<vmem>>) attributes {dimension_semantics = [#tpu.dimension_semantics<parallel>], iteration_bounds = array<i64: 2>, scalar_prefetch = 0 : i64, scratch_operands = 0 : i64, tpu.core_type = #tpu.core_type<tc>, window_params = [{transform_indices = @transform_0, window_bounds = array<i64: 512, 128>}, {pipeline_mode = #tpu.pipeline_mode<synchronous>, transform_indices = @transform_1, window_bounds = array<i64: 1, 128>}, {pipeline_mode = #tpu.pipeline_mode<synchronous>, transform_indices = @transform_2, window_bounds = array<i64: 1, 128>}, {transform_indices = @transform_3, window_bounds = array<i64: 512, 128>}]} {
    %c0 = arith.constant 0 : index
    %c0_0 = arith.constant 0 : index
    %0 = vector.load %arg1[%c0, %c0_0] : memref<512x128xf32, #tpu.memory_space<vmem>>, vector<512x128xf32>
    %c0_1 = arith.constant 0 : index
    %c0_2 = arith.constant 0 : index
    %1 = vector.load %arg2[%c0_1, %c0_2] : memref<1x128xf32, #tpu.memory_space<vmem>>, vector<1x128xf32>
    %2 = vector.broadcast %1 : vector<1x128xf32> to vector<512x128xf32>
    %3 = arith.mulf %0, %2 : vector<512x128xf32>
    %c0_3 = arith.constant 0 : index
    %c0_4 = arith.constant 0 : index
    %4 = vector.load %arg3[%c0_3, %c0_4] : memref<1x128xf32, #tpu.memory_space<vmem>>, vector<1x128xf32>
    %5 = vector.broadcast %4 : vector<1x128xf32> to vector<512x128xf32>
    %6 = arith.addf %3, %5 : vector<512x128xf32>
    %cst = arith.constant 0.000000e+00 : f32
    %7 = vector.broadcast %cst : f32 to vector<512x128xf32>
    %8 = arith.maximumf %6, %7 : vector<512x128xf32>
    %c0_5 = arith.constant 0 : index
    %c0_6 = arith.constant 0 : index
    %9 = vector.load %arg4[%c0_5, %c0_6] : memref<512x128xf32, #tpu.memory_space<vmem>>, vector<512x128xf32>
    tpu.vector_store %arg4[%c0_5, %c0_6], %8 {strides = array<i32>} : memref<512x128xf32, #tpu.memory_space<vmem>>, vector<512x128xf32>,
    return
  }
  func.func @transform_0(%arg0: i32) -> (i32, i32) {
    %c0_i32 = arith.constant 0 : i32
    %c0_i32_0 = arith.constant 0 : i32
    return %arg0, %c0_i32 : i32, i32
  }
  func.func @transform_1(%arg0: i32) -> (i32, i32) {
    %c0_i32 = arith.constant 0 : i32
    %c0_i32_0 = arith.constant 0 : i32
    %c0_i32_1 = arith.constant 0 : i32
    return %c0_i32, %c0_i32_0 : i32, i32
  }
  func.func @transform_2(%arg0: i32) -> (i32, i32) {
    %c0_i32 = arith.constant 0 : i32
    %c0_i32_0 = arith.constant 0 : i32
    %c0_i32_1 = arith.constant 0 : i32
    return %c0_i32, %c0_i32_0 : i32, i32
  }
  func.func @transform_3(%arg0: i32) -> (i32, i32) {
    %c0_i32 = arith.constant 0 : i32
    %c0_i32_0 = arith.constant 0 : i32
    return %arg0, %c0_i32 : i32, i32
  }
}

</mosaic_0001>

<bundles_post_ra>
// kernel: basic_conv_forward.2
= control target key start
LH: loop header
LB: loop body
LE: loop exit
PB: predicated region body
PF: predicated region fallthrough
CT: control target
= control target key end

     0   :  { %s1417_s12 = smov 0   ;;  %s1762_s0 = inlined_call_operand.vmem [shape: bf16[1024,128], index: 0, kind: input, shape index: {}]   ;;  %s1763_s1 = inlined_call_operand.vmem [shape: bf16[128,128], index: 1, kind: input, shape index: {}]   ;;  %s1764_s2 = inlined_call_operand.vmem [shape: f32[1024,128], index: 2, kind: output, shape index: {0}]   ;;  %s1765_s3 = inlined_call_operand.vmem [shape: f32[16,128], index: 3, kind: output, shape index: {1}]  }
   0x1 LB: > { %s1423_s13 = sadd.s32 4294967295, %s1395_s12   ;;  %p1157_p0 = scmp.ge.s32.totalorder %s1395_s12, 1  ;;  %s1395_s12 = sphi %s1417_s12, %s14_s12  }
   0x2   : > { %p141_p1 = scmp.lt.s32.totalorder %s1395_s12, 3 }
   0x4   : > { %p142_p2 = pnand %p1157_p0, %p141_p1 }
   0x5   : > { %v1349_v0 = vld [vmem:[%s1763_s1] sm:$0xff] (!%p142_p2)   ;;  %s1158_s16 = sshll.u32 (!%p142_p2), %s1423_s13, 6  ;;  %v1350_v1 = vld [vmem:[%s1763_s1 + $0x8] sm:$0xff] (!%p142_p2)   ;;  %v1351_v2 = vld [vmem:[%s1763_s1 + $0x10] sm:$0xff] (!%p142_p2)   ;;  %p181_p4 = scmp.lt.s32.totalorder (!%p142_p2), %s1423_s13, 1  ;;  %vm1061_vm0 = vcmask (!%p142_p2), 1040384  }
   0x6   : > { %145 = sbr.rel (%p142_p2) target bundleno = 396 (0x18c), region = 28  ;;  %p170_p3 = scmp.lt.s32.totalorder (!%p142_p2), %s1158_s16, 127  ;;  %1245 = vmatprep.subr.bf16.mxu0 (!%p142_p2), %v1349_v0  ;;  %1325 = vmatprep.subr.bf16.mxu1 (!%p142_p2), %v1349_v0  ;;  %v1352_v3 = vld [vmem:[%s1763_s1 + $0x18] sm:$0xff] (!%p142_p2)   ;;  %v1353_v5 = vld [vmem:[%s1763_s1 + $0x20] sm:$0xff] (!%p142_p2)   ;;  %v1354_v6 = vld [vmem:[%s1763_s1 + $0x28] sm:$0xff] (!%p142_p2)   ;;  %vm1063_vm1 = vcmask (!%p142_p2), 1041408  }
   0x7   : > { %1246 = vmatpush3.bf16.msra.mxu0 (!%p142_p2), %v1349_v0  ;;  %1333 = vmatpush3.bf16.msra.mxu1 (!%p142_p2), %v1349_v0  ;;  %v1355_v7 = vld [vmem:[%s1763_s1 + $0x30] sm:$0xff] (!%p142_p2)   ;;  %v1356_v8 = vld [vmem:[%s1763_s1 + $0x38] sm:$0xff] (!%p142_p2)  }
   0x8   : > { %1247 = vmatprep.subr.bf16.mxu0 (!%p142_p2), %v1350_v1  ;;  %1326 = vmatprep.subr.bf16.mxu1 (!%p142_p2), %v1350_v1 }
   0xb   : > { %1248 = vmatpush3.bf16.msra.mxu0 (!%p142_p2), %v1350_v1  ;;  %1334 = vmatpush3.bf16.msra.mxu1 (!%p142_p2), %v1350_v1 }
   0xc   : > { %1249 = vmatprep.subr.bf16.mxu0 (!%p142_p2), %v1351_v2  ;;  %1327 = vmatprep.subr.bf16.mxu1 (!%p142_p2), %v1351_v2 }
   0xd   : > { %s1767_s16 = smov (!%p170_p3, %s1158_s16), 127  ;;  %s1769_s13 = smov (!%p181_p4, %s1423_s13), 1 }
   0xe   : > { %s1159_s21 = sshll.u32 %s1767_s16, 2  ;;  %s1161_s8 = sshll.u32 %s1767_s16, 3 }
   0xf   : > { %s1443_s24 = scalar_lea.vmem %s1762_s0, %s1159_s21  ;;  %1250 = vmatpush3.bf16.msra.mxu0 %v1351_v2  ;;  %1335 = vmatpush3.bf16.msra.mxu1 %v1351_v2  ;;  %s1496_s11 = scalar_lea.vmem %s1764_s2, %s1161_s8 }
  0x10   : > { %v1357_v4 = vld [vmem:[%s1443_s24] sm:$0xff]   ;;  %1251 = vmatprep.subr.bf16.mxu0 %v1352_v3  ;;  %1328 = vmatprep.subr.bf16.mxu1 %v1352_v3  ;;  %v1358_v10 = vld [vmem:[%s1443_s24 + $0x8] sm:$0xff]   ;;  %v1359_v11 = vld [vmem:[%s1443_s24 + $0x10] sm:$0xff]   ;;  %s1162_s14 = sshll.u32 %s1769_s13, 3 }
  0x11   : > { %1261 = vmatprep.mubr.bf16.mxu0 %v1357_v4  ;;  %v1373_v9 = vld [vmem:[%s1443_s24 + $0x80] sm:$0xff]   ;;  %v1374_v12 = vld [vmem:[%s1443_s24 + $0x88] sm:$0xff]   ;;  %v1375_v13 = vld [vmem:[%s1443_s24 + $0x90] sm:$0xff]   ;;  %s184_s17 = scalar_lea.vmem %s1765_s3, %s1162_s14 }
  0x12   : > { %1293 = vmatprep.mubr.bf16.mxu1 %v1373_v9  ;;  %v1360_v14 = vld [vmem:[%s1443_s24 + $0x18] sm:$0xff]   ;;  %v1361_v15 = vld [vmem:[%s1443_s24 + $0x20] sm:$0xff]   ;;  %v1362_v18 = vld [vmem:[%s1443_s24 + $0x28] sm:$0xff]  }
  0x13   : > { %1252 = vmatpush3.bf16.msra.mxu0 %v1352_v3  ;;  %1336 = vmatpush3.bf16.msra.mxu1 %v1352_v3  ;;  %v1376_v16 = vld [vmem:[%s1443_s24 + $0x98] sm:$0xff]   ;;  %v1377_v17 = vld [vmem:[%s1443_s24 + $0xa0] sm:$0xff]   ;;  %v1378_v19 = vld [vmem:[%s1443_s24 + $0xa8] sm:$0xff]  }
  0x14   : > { %1253 = vmatprep.subr.bf16.mxu0 %v1353_v5  ;;  %1329 = vmatprep.subr.bf16.mxu1 %v1353_v5  ;;  %v1363_v20 = vld [vmem:[%s1443_s24 + $0x30] sm:$0xff]   ;;  %v1364_v22 = vld [vmem:[%s1443_s24 + $0x38] sm:$0xff]   ;;  %v1365_v24 = vld [vmem:[%s1443_s24 + $0x40] sm:$0xff]  }
  0x15   : > { %v1379_v21 = vld [vmem:[%s1443_s24 + $0xb0] sm:$0xff]   ;;  %v1380_v23 = vld [vmem:[%s1443_s24 + $0xb8] sm:$0xff]   ;;  %v1381_v25 = vld [vmem:[%s1443_s24 + $0xc0] sm:$0xff]  }
  0x16   : > { %v1366_v26 = vld [vmem:[%s1443_s24 + $0x48] sm:$0xff]   ;;  %v1367_v28 = vld [vmem:[%s1443_s24 + $0x50] sm:$0xff]   ;;  %v1368_v30 = vld [vmem:[%s1443_s24 + $0x58] sm:$0xff]  }
  0x17   : > { %1254 = vmatpush3.bf16.msra.mxu0 %v1353_v5  ;;  %1337 = vmatpush3.bf16.msra.mxu1 %v1353_v5  ;;  %v1382_v27 = vld [vmem:[%s1443_s24 + $0xc8] sm:$0xff]   ;;  %v1383_v29 = vld [vmem:[%s1443_s24 + $0xd0] sm:$0xff]   ;;  %v1384_v31 = vld [vmem:[%s1443_s24 + $0xd8] sm:$0xff]  }
  0x18   : > { %1255 = vmatprep.subr.bf16.mxu0 %v1354_v6  ;;  %1330 = vmatprep.subr.bf16.mxu1 %v1354_v6  ;;  %v1369_v32 = vld [vmem:[%s1443_s24 + $0x60] sm:$0xff]   ;;  %v1370_v34 = vld [vmem:[%s1443_s24 + $0x68] sm:$0xff]   ;;  %v1371_v36 = vld [vmem:[%s1443_s24 + $0x70] sm:$0xff]  }
  0x19   : > { %v1385_v33 = vld [vmem:[%s1443_s24 + $0xe0] sm:$0xff]   ;;  %v1386_v35 = vld [vmem:[%s1443_s24 + $0xe8] sm:$0xff]   ;;  %v1387_v37 = vld [vmem:[%s1443_s24 + $0xf0] sm:$0xff]  }
  0x1a   : > { %v1372_v38 = vld [vmem:[%s1443_s24 + $0x78] sm:$0xff]  }
  0x1b   : > { %1256 = vmatpush3.bf16.msra.mxu0 %v1354_v6  ;;  %1338 = vmatpush3.bf16.msra.mxu1 %v1354_v6  ;;  %v1388_v39 = vld [vmem:[%s1443_s24 + $0xf8] sm:$0xff]  }
  0x1c   : > { %1257 = vmatprep.subr.bf16.mxu0 %v1355_v7  ;;  %1331 = vmatprep.subr.bf16.mxu1 %v1355_v7 }
  0x1f   : > { %1258 = vmatpush3.bf16.msra.mxu0 %v1355_v7  ;;  %1339 = vmatpush3.bf16.msra.mxu1 %v1355_v7 }
  0x20   : > { %1259 = vmatprep.subr.bf16.mxu0 %v1356_v8  ;;  %1332 = vmatprep.subr.bf16.mxu1 %v1356_v8 }
  0x23   : > { %1260 = vmatpush3.bf16.msra.mxu0 %v1356_v8  ;;  %1340 = vmatpush3.bf16.msra.mxu1 %v1356_v8 }
  0x26   : > { %1262 = vmatmul.mubr.bf16.vlgmr.msra.gmra.mrb[0].mxu0 %v1358_v10  ;;  %1294 = vmatmul.mubr.bf16.vlgmr.msra.gmra.mrb[0].mxu1 %v1374_v12 }
  0x27   : > { %1265 = vmatprep.mubr.bf16.mxu0 %v1359_v11  ;;  %1297 = vmatprep.mubr.bf16.mxu1 %v1375_v13 }
  0x2e   : > { %1266 = vmatmul.mubr.bf16.gmra.mrb[4].mxu0 %v1360_v14  ;;  %1298 = vmatmul.mubr.bf16.gmra.mrb[4].mxu1 %v1376_v16 }
  0x2f   : > { %1269 = vmatprep.mubr.bf16.mxu0 %v1361_v15  ;;  %1301 = vmatprep.mubr.bf16.mxu1 %v1377_v17 }
  0x36   : > { %1270 = vmatmul.mubr.bf16.gmra.mrb[8].mxu0 %v1362_v18  ;;  %1302 = vmatmul.mubr.bf16.gmra.mrb[8].mxu1 %v1378_v19 }
  0x37   : > { %1273 = vmatprep.mubr.bf16.mxu0 %v1363_v20  ;;  %1305 = vmatprep.mubr.bf16.mxu1 %v1379_v21 }
  0x3e   : > { %1274 = vmatmul.mubr.bf16.gmra.mrb[12].mxu0 %v1364_v22  ;;  %1306 = vmatmul.mubr.bf16.gmra.mrb[12].mxu1 %v1380_v23 }
  0x3f   : > { %1277 = vmatprep.mubr.bf16.mxu0 %v1365_v24  ;;  %1309 = vmatprep.mubr.bf16.mxu1 %v1381_v25 }
  0x46   : > { %1278 = vmatmul.mubr.bf16.gmra.mrb[16].mxu0 %v1366_v26  ;;  %1310 = vmatmul.mubr.bf16.gmra.mrb[16].mxu1 %v1382_v27 }
  0x47   : > { %1281 = vmatprep.mubr.bf16.mxu0 %v1367_v28  ;;  %1313 = vmatprep.mubr.bf16.mxu1 %v1383_v29 }
  0x4e   : > { %1282 = vmatmul.mubr.bf16.gmra.mrb[20].mxu0 %v1368_v30  ;;  %1314 = vmatmul.mubr.bf16.gmra.mrb[20].mxu1 %v1384_v31 }
  0x4f   : > { %1285 = vmatprep.mubr.bf16.mxu0 %v1369_v32  ;;  %1317 = vmatprep.mubr.bf16.mxu1 %v1385_v33 }
  0x56   : > { %1286 = vmatmul.mubr.bf16.gmra.mrb[24].mxu0 %v1370_v34  ;;  %1318 = vmatmul.mubr.bf16.gmra.mrb[24].mxu1 %v1386_v35 }
  0x57   : > { %1289 = vmatprep.mubr.bf16.mxu0 %v1371_v36  ;;  %1321 = vmatprep.mubr.bf16.mxu1 %v1387_v37 }
  0x5e   : > { %1290 = vmatmul.mubr.bf16.gmra.mrb[28].mxu0 %v1372_v38  ;;  %1322 = vmatmul.mubr.bf16.gmra.mrb[28].mxu1 %v1388_v39 }
  0xf9   : > { %v1263_v40 = vpop.f32.mrb[0].mxu0  ;;  %v1498_v41 = vpop.f32.mrb[0].mxu1 }
  0xfa   : > { %797 = vst [vmem:[%s1496_s11 + $0x10] sm:$0xff] %v1263_v40  ;;  %v540_v42 = vpop.f32.mrb[1].mxu0  ;;  %829 = vst [vmem:[%s1496_s11 + $0x110] sm:$0xff] %v1498_v41  ;;  %v1503_v43 = vpop.f32.mrb[1].mxu1  ;;  %v930_v51 = vmul.f32 %v1263_v40, %v1263_v40 }
  0xfb   : > { %795 = vst [vmem:[%s1496_s11] sm:$0xff] %v540_v42  ;;  %v1264_v44 = vpop.f32.mrb[2].mxu0  ;;  %827 = vst [vmem:[%s1496_s11 + $0x100] sm:$0xff] %v1503_v43  ;;  %v1508_v45 = vpop.f32.mrb[2].mxu1  ;;  %v928_v48 = vmul.f32 %v540_v42, %v540_v42 }
  0xfc   : > { %798 = vst [vmem:[%s1496_s11 + $0x18] sm:$0xff] %v1264_v44  ;;  %v543_v46 = vpop.f32.mrb[3].mxu0  ;;  %830 = vst [vmem:[%s1496_s11 + $0x118] sm:$0xff] %v1508_v45  ;;  %v1513_v47 = vpop.f32.mrb[3].mxu1  ;;  %v931_v54 = vmul.f32 %v1264_v44, %v1264_v44 }
  0xfd   : > { %796 = vst [vmem:[%s1496_s11 + $0x8] sm:$0xff] %v543_v46  ;;  %v859_v49 = vadd.f32 %v543_v46, %v540_v42  ;;  %v929_v50 = vmul.f32 %v543_v46, %v543_v46  ;;  %828 = vst [vmem:[%s1496_s11 + $0x108] sm:$0xff] %v1513_v47 }
  0xff   : > { %v860_v52 = vadd.f32 %v1263_v40, %v859_v49  ;;  %v992_v53 = vadd.f32 %v929_v50, %v928_v48 }
 0x101   : > { %v993_v55 = vadd.f32 %v992_v53, %v930_v51  ;;  %v1267_v56 = vpop.f32.mrb[4].mxu0  ;;  %v861_v57 = vadd.f32 %v1264_v44, %v860_v52  ;;  %v1518_v58 = vpop.f32.mrb[4].mxu1 }
 0x102   : > { %801 = vst [vmem:[%s1496_s11 + $0x30] sm:$0xff] %v1267_v56  ;;  %v556_v59 = vpop.f32.mrb[5].mxu0  ;;  %833 = vst [vmem:[%s1496_s11 + $0x130] sm:$0xff] %v1518_v58  ;;  %v1523_v60 = vpop.f32.mrb[5].mxu1  ;;  %v934_v7 = vmul.f32 %v1267_v56, %v1267_v56 }
 0x103   : > { %799 = vst [vmem:[%s1496_s11 + $0x20] sm:$0xff] %v556_v59  ;;  %v862_v61 = vadd.f32 %v861_v57, %v556_v59  ;;  %v932_v62 = vmul.f32 %v556_v59, %v556_v59  ;;  %v994_v63 = vadd.f32 %v993_v55, %v931_v54  ;;  %v1268_v0 = vpop.f32.mrb[6].mxu0  ;;  %831 = vst [vmem:[%s1496_s11 + $0x120] sm:$0xff] %v1523_v60  ;;  %v1528_v1 = vpop.f32.mrb[6].mxu1 }
 0x104   : > { %802 = vst [vmem:[%s1496_s11 + $0x38] sm:$0xff] %v1268_v0  ;;  %v559_v2 = vpop.f32.mrb[7].mxu0  ;;  %834 = vst [vmem:[%s1496_s11 + $0x138] sm:$0xff] %v1528_v1  ;;  %v1533_v3 = vpop.f32.mrb[7].mxu1  ;;  %v935_v10 = vmul.f32 %v1268_v0, %v1268_v0 }
 0x105   : > { %v995_v4 = vadd.f32 %v994_v63, %v932_v62  ;;  %800 = vst [vmem:[%s1496_s11 + $0x28] sm:$0xff] %v559_v2  ;;  %v863_v5 = vadd.f32 %v862_v61, %v559_v2  ;;  %v933_v6 = vmul.f32 %v559_v2, %v559_v2  ;;  %832 = vst [vmem:[%s1496_s11 + $0x128] sm:$0xff] %v1533_v3 }
 0x107   : > { %v864_v8 = vadd.f32 %v1267_v56, %v863_v5  ;;  %v996_v9 = vadd.f32 %v995_v4, %v933_v6 }
 0x109   : > { %v997_v11 = vadd.f32 %v996_v9, %v934_v7  ;;  %v1271_v12 = vpop.f32.mrb[8].mxu0  ;;  %v865_v13 = vadd.f32 %v1268_v0, %v864_v8  ;;  %v1538_v14 = vpop.f32.mrb[8].mxu1 }
 0x10a   : > { %805 = vst [vmem:[%s1496_s11 + $0x50] sm:$0xff] %v1271_v12  ;;  %v572_v15 = vpop.f32.mrb[9].mxu0  ;;  %837 = vst [vmem:[%s1496_s11 + $0x150] sm:$0xff] %v1538_v14  ;;  %v1543_v16 = vpop.f32.mrb[9].mxu1  ;;  %v938_v27 = vmul.f32 %v1271_v12, %v1271_v12 }
 0x10b   : > { %803 = vst [vmem:[%s1496_s11 + $0x40] sm:$0xff] %v572_v15  ;;  %v866_v17 = vadd.f32 %v865_v13, %v572_v15  ;;  %v936_v18 = vmul.f32 %v572_v15, %v572_v15  ;;  %v998_v19 = vadd.f32 %v997_v11, %v935_v10  ;;  %v1272_v20 = vpop.f32.mrb[10].mxu0  ;;  %835 = vst [vmem:[%s1496_s11 + $0x140] sm:$0xff] %v1543_v16  ;;  %v1548_v21 = vpop.f32.mrb[10].mxu1 }
 0x10c   : > { %806 = vst [vmem:[%s1496_s11 + $0x58] sm:$0xff] %v1272_v20  ;;  %v575_v22 = vpop.f32.mrb[11].mxu0  ;;  %838 = vst [vmem:[%s1496_s11 + $0x158] sm:$0xff] %v1548_v21  ;;  %v1553_v23 = vpop.f32.mrb[11].mxu1  ;;  %v939_v30 = vmul.f32 %v1272_v20, %v1272_v20 }
 0x10d   : > { %v999_v24 = vadd.f32 %v998_v19, %v936_v18  ;;  %804 = vst [vmem:[%s1496_s11 + $0x48] sm:$0xff] %v575_v22  ;;  %v867_v25 = vadd.f32 %v866_v17, %v575_v22  ;;  %v937_v26 = vmul.f32 %v575_v22, %v575_v22  ;;  %836 = vst [vmem:[%s1496_s11 + $0x148] sm:$0xff] %v1553_v23 }
 0x10f   : > { %v868_v28 = vadd.f32 %v1271_v12, %v867_v25  ;;  %v1000_v29 = vadd.f32 %v999_v24, %v937_v26 }
 0x111   : > { %v1001_v31 = vadd.f32 %v1000_v29, %v938_v27  ;;  %v1275_v32 = vpop.f32.mrb[12].mxu0  ;;  %v869_v33 = vadd.f32 %v1272_v20, %v868_v28  ;;  %v1558_v34 = vpop.f32.mrb[12].mxu1 }
 0x112   : > { %809 = vst [vmem:[%s1496_s11 + $0x70] sm:$0xff] %v1275_v32  ;;  %v588_v35 = vpop.f32.mrb[13].mxu0  ;;  %841 = vst [vmem:[%s1496_s11 + $0x170] sm:$0xff] %v1558_v34  ;;  %v1563_v36 = vpop.f32.mrb[13].mxu1  ;;  %v942_v51 = vmul.f32 %v1275_v32, %v1275_v32 }
 0x113   : > { %807 = vst [vmem:[%s1496_s11 + $0x60] sm:$0xff] %v588_v35  ;;  %v870_v37 = vadd.f32 %v869_v33, %v588_v35  ;;  %v940_v38 = vmul.f32 %v588_v35, %v588_v35  ;;  %v1002_v39 = vadd.f32 %v1001_v31, %v939_v30  ;;  %v1276_v40 = vpop.f32.mrb[14].mxu0  ;;  %839 = vst [vmem:[%s1496_s11 + $0x160] sm:$0xff] %v1563_v36  ;;  %v1568_v42 = vpop.f32.mrb[14].mxu1 }
 0x114   : > { %810 = vst [vmem:[%s1496_s11 + $0x78] sm:$0xff] %v1276_v40  ;;  %v591_v44 = vpop.f32.mrb[15].mxu0  ;;  %842 = vst [vmem:[%s1496_s11 + $0x178] sm:$0xff] %v1568_v42  ;;  %v1573_v46 = vpop.f32.mrb[15].mxu1  ;;  %v943_v54 = vmul.f32 %v1276_v40, %v1276_v40 }
 0x115   : > { %v1003_v48 = vadd.f32 %v1002_v39, %v940_v38  ;;  %808 = vst [vmem:[%s1496_s11 + $0x68] sm:$0xff] %v591_v44  ;;  %v871_v49 = vadd.f32 %v870_v37, %v591_v44  ;;  %v941_v50 = vmul.f32 %v591_v44, %v591_v44  ;;  %840 = vst [vmem:[%s1496_s11 + $0x168] sm:$0xff] %v1573_v46 }
 0x117   : > { %v872_v52 = vadd.f32 %v1275_v32, %v871_v49  ;;  %v1004_v53 = vadd.f32 %v1003_v48, %v941_v50 }
 0x119   : > { %v1005_v55 = vadd.f32 %v1004_v53, %v942_v51  ;;  %v1279_v56 = vpop.f32.mrb[16].mxu0  ;;  %v873_v57 = vadd.f32 %v1276_v40, %v872_v52  ;;  %v1578_v59 = vpop.f32.mrb[16].mxu1 }
 0x11a   : > { %813 = vst [vmem:[%s1496_s11 + $0x90] sm:$0xff] %v1279_v56  ;;  %v604_v61 = vpop.f32.mrb[17].mxu0  ;;  %845 = vst [vmem:[%s1496_s11 + $0x190] sm:$0xff] %v1578_v59  ;;  %v1583_v62 = vpop.f32.mrb[17].mxu1  ;;  %v946_v11 = vmul.f32 %v1279_v56, %v1279_v56 }
 0x11b   : > { %811 = vst [vmem:[%s1496_s11 + $0x80] sm:$0xff] %v604_v61  ;;  %v874_v63 = vadd.f32 %v873_v57, %v604_v61  ;;  %v944_v0 = vmul.f32 %v604_v61, %v604_v61  ;;  %v1006_v2 = vadd.f32 %v1005_v55, %v943_v54  ;;  %v1280_v4 = vpop.f32.mrb[18].mxu0  ;;  %843 = vst [vmem:[%s1496_s11 + $0x180] sm:$0xff] %v1583_v62  ;;  %v1588_v5 = vpop.f32.mrb[18].mxu1 }
 0x11c   : > { %814 = vst [vmem:[%s1496_s11 + $0x98] sm:$0xff] %v1280_v4  ;;  %v607_v6 = vpop.f32.mrb[19].mxu0  ;;  %846 = vst [vmem:[%s1496_s11 + $0x198] sm:$0xff] %v1588_v5  ;;  %v1593_v7 = vpop.f32.mrb[19].mxu1  ;;  %v947_v15 = vmul.f32 %v1280_v4, %v1280_v4 }
 0x11d   : > { %v1007_v8 = vadd.f32 %v1006_v2, %v944_v0  ;;  %812 = vst [vmem:[%s1496_s11 + $0x88] sm:$0xff] %v607_v6  ;;  %v875_v9 = vadd.f32 %v874_v63, %v607_v6  ;;  %v945_v10 = vmul.f32 %v607_v6, %v607_v6  ;;  %844 = vst [vmem:[%s1496_s11 + $0x188] sm:$0xff] %v1593_v7 }
 0x11f   : > { %v876_v12 = vadd.f32 %v1279_v56, %v875_v9  ;;  %v1008_v13 = vadd.f32 %v1007_v8, %v945_v10 }
 0x121   : > { %v1009_v17 = vadd.f32 %v1008_v13, %v946_v11  ;;  %v1283_v18 = vpop.f32.mrb[20].mxu0  ;;  %v877_v19 = vadd.f32 %v1280_v4, %v876_v12  ;;  %v1598_v20 = vpop.f32.mrb[20].mxu1 }
 0x122   : > { %817 = vst [vmem:[%s1496_s11 + $0xb0] sm:$0xff] %v1283_v18  ;;  %v620_v22 = vpop.f32.mrb[21].mxu0  ;;  %849 = vst [vmem:[%s1496_s11 + $0x1b0] sm:$0xff] %v1598_v20  ;;  %v1603_v24 = vpop.f32.mrb[21].mxu1  ;;  %v950_v37 = vmul.f32 %v1283_v18, %v1283_v18 }
 0x123   : > { %815 = vst [vmem:[%s1496_s11 + $0xa0] sm:$0xff] %v620_v22  ;;  %v878_v25 = vadd.f32 %v877_v19, %v620_v22  ;;  %v948_v26 = vmul.f32 %v620_v22, %v620_v22  ;;  %v1010_v27 = vadd.f32 %v1009_v17, %v947_v15  ;;  %v1284_v28 = vpop.f32.mrb[22].mxu0  ;;  %847 = vst [vmem:[%s1496_s11 + $0x1a0] sm:$0xff] %v1603_v24  ;;  %v1608_v29 = vpop.f32.mrb[22].mxu1 }
 0x124   : > { %818 = vst [vmem:[%s1496_s11 + $0xb8] sm:$0xff] %v1284_v28  ;;  %v623_v30 = vpop.f32.mrb[23].mxu0  ;;  %850 = vst [vmem:[%s1496_s11 + $0x1b8] sm:$0xff] %v1608_v29  ;;  %v1613_v31 = vpop.f32.mrb[23].mxu1  ;;  %v951_v40 = vmul.f32 %v1284_v28, %v1284_v28 }
 0x125   : > { %v1011_v32 = vadd.f32 %v1010_v27, %v948_v26  ;;  %816 = vst [vmem:[%s1496_s11 + $0xa8] sm:$0xff] %v623_v30  ;;  %v879_v33 = vadd.f32 %v878_v25, %v623_v30  ;;  %v949_v35 = vmul.f32 %v623_v30, %v623_v30  ;;  %848 = vst [vmem:[%s1496_s11 + $0x1a8] sm:$0xff] %v1613_v31 }
 0x127   : > { %v880_v38 = vadd.f32 %v1283_v18, %v879_v33  ;;  %v1012_v39 = vadd.f32 %v1011_v32, %v949_v35 }
 0x129   : > { %v1013_v44 = vadd.f32 %v1012_v39, %v950_v37  ;;  %v1287_v48 = vpop.f32.mrb[24].mxu0  ;;  %v881_v49 = vadd.f32 %v1284_v28, %v880_v38  ;;  %v1618_v50 = vpop.f32.mrb[24].mxu1 }
 0x12a   : > { %821 = vst [vmem:[%s1496_s11 + $0xd0] sm:$0xff] %v1287_v48  ;;  %v636_v51 = vpop.f32.mrb[25].mxu0  ;;  %853 = vst [vmem:[%s1496_s11 + $0x1d0] sm:$0xff] %v1618_v50  ;;  %v1623_v52 = vpop.f32.mrb[25].mxu1  ;;  %v954_v6 = vmul.f32 %v1287_v48, %v1287_v48 }
 0x12b   : > { %819 = vst [vmem:[%s1496_s11 + $0xc0] sm:$0xff] %v636_v51  ;;  %v882_v53 = vadd.f32 %v881_v49, %v636_v51  ;;  %v952_v54 = vmul.f32 %v636_v51, %v636_v51  ;;  %v1014_v55 = vadd.f32 %v1013_v44, %v951_v40  ;;  %v1288_v56 = vpop.f32.mrb[26].mxu0  ;;  %851 = vst [vmem:[%s1496_s11 + $0x1c0] sm:$0xff] %v1623_v52  ;;  %v1628_v57 = vpop.f32.mrb[26].mxu1 }
 0x12c   : > { %822 = vst [vmem:[%s1496_s11 + $0xd8] sm:$0xff] %v1288_v56  ;;  %v639_v61 = vpop.f32.mrb[27].mxu0  ;;  %854 = vst [vmem:[%s1496_s11 + $0x1d8] sm:$0xff] %v1628_v57  ;;  %v1633_v63 = vpop.f32.mrb[27].mxu1  ;;  %v955_v10 = vmul.f32 %v1288_v56, %v1288_v56  ;;  %v960_v49 = vmul.f32 %v1503_v43, %v1503_v43 }
 0x12d   : > { %v1015_v0 = vadd.f32 %v1014_v55, %v952_v54  ;;  %820 = vst [vmem:[%s1496_s11 + $0xc8] sm:$0xff] %v639_v61  ;;  %v883_v2 = vadd.f32 %v882_v53, %v639_v61  ;;  %v953_v4 = vmul.f32 %v639_v61, %v639_v61  ;;  %852 = vst [vmem:[%s1496_s11 + $0x1c8] sm:$0xff] %v1633_v63 }
 0x12e   : > { %v962_v61 = vmul.f32 %v1498_v41, %v1498_v41 }
 0x12f   : > { %v884_v8 = vadd.f32 %v1287_v48, %v883_v2  ;;  %v1016_v9 = vadd.f32 %v1015_v0, %v953_v4  ;;  %v963_v4 = vmul.f32 %v1508_v45, %v1508_v45 }
 0x131   : > { %v1017_v11 = vadd.f32 %v1016_v9, %v954_v6  ;;  %v1291_v12 = vpop.f32.mrb[28].mxu0  ;;  %v885_v13 = vadd.f32 %v1288_v56, %v884_v8  ;;  %v1638_v15 = vpop.f32.mrb[28].mxu1  ;;  %v961_v56 = vmul.f32 %v1513_v47, %v1513_v47 }
 0x132   : > { %825 = vst [vmem:[%s1496_s11 + $0xf0] sm:$0xff] %v1291_v12  ;;  %v652_v17 = vpop.f32.mrb[29].mxu0  ;;  %857 = vst [vmem:[%s1496_s11 + $0x1f0] sm:$0xff] %v1638_v15  ;;  %v1643_v18 = vpop.f32.mrb[29].mxu1  ;;  %v958_v37 = vmul.f32 %v1291_v12, %v1291_v12 }
 0x133   : > { %823 = vst [vmem:[%s1496_s11 + $0xe0] sm:$0xff] %v652_v17  ;;  %v886_v19 = vadd.f32 %v885_v13, %v652_v17  ;;  %v956_v22 = vmul.f32 %v652_v17, %v652_v17  ;;  %v1018_v25 = vadd.f32 %v1017_v11, %v955_v10  ;;  %v1292_v26 = vpop.f32.mrb[30].mxu0  ;;  %855 = vst [vmem:[%s1496_s11 + $0x1e0] sm:$0xff] %v1643_v18  ;;  %v1648_v27 = vpop.f32.mrb[30].mxu1 }
 0x134   : > { %826 = vst [vmem:[%s1496_s11 + $0xf8] sm:$0xff] %v1292_v26  ;;  %v655_v28 = vpop.f32.mrb[31].mxu0  ;;  %858 = vst [vmem:[%s1496_s11 + $0x1f8] sm:$0xff] %v1648_v27  ;;  %v1653_v30 = vpop.f32.mrb[31].mxu1  ;;  %v959_v40 = vmul.f32 %v1292_v26, %v1292_v26 }
 0x135   : > { %v1019_v32 = vadd.f32 %v1018_v25, %v956_v22  ;;  %824 = vst [vmem:[%s1496_s11 + $0xe8] sm:$0xff] %v655_v28  ;;  %v887_v33 = vadd.f32 %v886_v19, %v655_v28  ;;  %v957_v35 = vmul.f32 %v655_v28, %v655_v28  ;;  %856 = vst [vmem:[%s1496_s11 + $0x1e8] sm:$0xff] %v1653_v30 }
 0x137   : > { %v888_v38 = vadd.f32 %v1291_v12, %v887_v33  ;;  %v1020_v39 = vadd.f32 %v1019_v32, %v957_v35  ;;  %v965_v12 = vmul.f32 %v1533_v3, %v1533_v3  ;;  %v969_v32 = vmul.f32 %v1553_v23, %v1553_v23 }
 0x139   : > { %v1021_v44 = vadd.f32 %v1020_v39, %v958_v37  ;;  %v889_v48 = vadd.f32 %v1292_v26, %v888_v38 }
 0x13b   : > { %v890_v51 = vadd.f32 %v889_v48, %v1503_v43  ;;  %v1022_v53 = vadd.f32 %v1021_v44, %v959_v40  ;;  %v964_v43 = vmul.f32 %v1523_v60, %v1523_v60  ;;  %v973_v48 = vmul.f32 %v1573_v46, %v1573_v46 }
 0x13d   : > { %v1023_v54 = vadd.f32 %v1022_v53, %v960_v49  ;;  %v891_v55 = vadd.f32 %v890_v51, %v1513_v47 }
 0x13f   : > { %v892_v0 = vadd.f32 %v1498_v41, %v891_v55  ;;  %v1024_v2 = vadd.f32 %v1023_v54, %v961_v56  ;;  %v966_v41 = vmul.f32 %v1518_v58, %v1518_v58 }
 0x141   : > { %v1025_v6 = vadd.f32 %v1024_v2, %v962_v61  ;;  %v893_v8 = vadd.f32 %v1508_v45, %v892_v0  ;;  %v967_v45 = vmul.f32 %v1528_v1, %v1528_v1  ;;  %v977_v0 = vmul.f32 %v1593_v7, %v1593_v7 }
 0x143   : > { %v894_v9 = vadd.f32 %v893_v8, %v1523_v60  ;;  %v1026_v10 = vadd.f32 %v1025_v6, %v963_v4  ;;  %v968_v60 = vmul.f32 %v1543_v16, %v1543_v16 }
 0x145   : > { %v1027_v11 = vadd.f32 %v1026_v10, %v964_v43  ;;  %v895_v47 = vadd.f32 %v894_v9, %v1533_v3 }
 0x147   : > { %v896_v13 = vadd.f32 %v1518_v58, %v895_v47  ;;  %v1028_v17 = vadd.f32 %v1027_v11, %v965_v12  ;;  %v970_v58 = vmul.f32 %v1538_v14, %v1538_v14  ;;  %v981_v11 = vmul.f32 %v1613_v31, %v1613_v31 }
 0x149   : > { %v1029_v19 = vadd.f32 %v1028_v17, %v966_v41  ;;  %v897_v22 = vadd.f32 %v1528_v1, %v896_v13  ;;  %v971_v1 = vmul.f32 %v1548_v21, %v1548_v21 }
 0x14b   : > { %v898_v25 = vadd.f32 %v897_v22, %v1543_v16  ;;  %v1030_v26 = vadd.f32 %v1029_v19, %v967_v45  ;;  %v972_v16 = vmul.f32 %v1563_v36, %v1563_v36  ;;  %v985_v22 = vmul.f32 %v1633_v63, %v1633_v63 }
 0x14d   : > { %v1031_v28 = vadd.f32 %v1030_v26, %v968_v60  ;;  %v899_v3 = vadd.f32 %v898_v25, %v1553_v23 }
 0x14f   : > { %v900_v33 = vadd.f32 %v1538_v14, %v899_v3  ;;  %v1032_v35 = vadd.f32 %v1031_v28, %v969_v32  ;;  %v974_v14 = vmul.f32 %v1558_v34, %v1558_v34  ;;  %v988_v28 = vmul.f32 %v1643_v18, %v1643_v18 }
 0x151   : > { %v1033_v37 = vadd.f32 %v1032_v35, %v970_v58  ;;  %v901_v38 = vadd.f32 %v1548_v21, %v900_v33  ;;  %v975_v21 = vmul.f32 %v1568_v42, %v1568_v42  ;;  %v990_v33 = vmul.f32 %v1638_v15, %v1638_v15 }
 0x153   : > { %v902_v39 = vadd.f32 %v901_v38, %v1563_v36  ;;  %v1034_v40 = vadd.f32 %v1033_v37, %v971_v1  ;;  %v976_v36 = vmul.f32 %v1583_v62, %v1583_v62 }
 0x155   : > { %v1035_v44 = vadd.f32 %v1034_v40, %v972_v16  ;;  %v903_v23 = vadd.f32 %v902_v39, %v1573_v46 }
 0x157   : > { %v904_v49 = vadd.f32 %v1558_v34, %v903_v23  ;;  %v1036_v51 = vadd.f32 %v1035_v44, %v973_v48  ;;  %v978_v34 = vmul.f32 %v1578_v59, %v1578_v59 }
 0x159   : > { %v1037_v53 = vadd.f32 %v1036_v51, %v974_v14  ;;  %v905_v54 = vadd.f32 %v1568_v42, %v904_v49  ;;  %v979_v42 = vmul.f32 %v1588_v5, %v1588_v5 }
 0x15b   : > { %v906_v55 = vadd.f32 %v905_v54, %v1583_v62  ;;  %v1038_v56 = vadd.f32 %v1037_v53, %v975_v21  ;;  %v980_v62 = vmul.f32 %v1603_v24, %v1603_v24 }
 0x15d   : > { %v1039_v61 = vadd.f32 %v1038_v56, %v976_v36  ;;  %v907_v46 = vadd.f32 %v906_v55, %v1593_v7 }
 0x15f   : > { %v908_v2 = vadd.f32 %v1578_v59, %v907_v46  ;;  %v1040_v4 = vadd.f32 %v1039_v61, %v977_v0  ;;  %v982_v59 = vmul.f32 %v1598_v20, %v1598_v20 }
 0x161   : > { %v1041_v6 = vadd.f32 %v1040_v4, %v978_v34  ;;  %v909_v8 = vadd.f32 %v1588_v5, %v908_v2  ;;  %v983_v5 = vmul.f32 %v1608_v29, %v1608_v29 }
 0x163   : > { %v910_v43 = vadd.f32 %v909_v8, %v1603_v24  ;;  %v1042_v9 = vadd.f32 %v1041_v6, %v979_v42  ;;  %v984_v24 = vmul.f32 %v1623_v52, %v1623_v52 }
 0x165   : > { %v1043_v10 = vadd.f32 %v1042_v9, %v980_v62  ;;  %v911_v7 = vadd.f32 %v910_v43, %v1613_v31 }
 0x167   : > { %v912_v47 = vadd.f32 %v1598_v20, %v911_v7  ;;  %v1044_v12 = vadd.f32 %v1043_v10, %v981_v11  ;;  %v986_v20 = vmul.f32 %v1618_v50, %v1618_v50 }
 0x169   : > { %v1045_v41 = vadd.f32 %v1044_v12, %v982_v59  ;;  %v913_v13 = vadd.f32 %v1608_v29, %v912_v47  ;;  %v987_v29 = vmul.f32 %v1628_v57, %v1628_v57 }
 0x16b   : > { %v914_v17 = vadd.f32 %v913_v13, %v1623_v52  ;;  %v1046_v45 = vadd.f32 %v1045_v41, %v983_v5 }
 0x16d   : > { %v1047_v19 = vadd.f32 %v1046_v45, %v984_v24  ;;  %v915_v31 = vadd.f32 %v914_v17, %v1633_v63 }
 0x16f   : > { %v916_v60 = vadd.f32 %v1618_v50, %v915_v31  ;;  %v1048_v25 = vadd.f32 %v1047_v19, %v985_v22  ;;  %v989_v50 = vmul.f32 %v1653_v30, %v1653_v30 }
 0x171   : > { %v1049_v26 = vadd.f32 %v1048_v25, %v986_v20  ;;  %v917_v52 = vadd.f32 %v1628_v57, %v916_v60  ;;  %v991_v57 = vmul.f32 %v1648_v27, %v1648_v27 }
 0x173   : > { %v918_v3 = vadd.f32 %v917_v52, %v1643_v18  ;;  %v1050_v32 = vadd.f32 %v1049_v26, %v987_v29 }
 0x175   : > { %v1051_v63 = vadd.f32 %v1050_v32, %v988_v28  ;;  %v919_v58 = vadd.f32 %v918_v3, %v1653_v30 }
 0x177   : > { %v920_v35 = vadd.f32 %v1638_v15, %v919_v58  ;;  %v1052_v1 = vadd.f32 %v1051_v63, %v989_v50 }
 0x179   : > { %v921_v37 = vadd.f32 %v1648_v27, %v920_v35  ;;  %v1053_v18 = vadd.f32 %v1052_v1, %v990_v33 }
 0x17b   : > { %v922_v38 = vrot.slane %v921_v37, 4  ;;  %v1054_v16 = vadd.f32 %v1053_v18, %v991_v57 }
 0x17d   : > { %v923_v39 = vadd.f32 %v922_v38, %v921_v37  ;;  %v1055_v40 = vrot.slane %v1054_v16, 4 }
 0x17f   : > { %v924_v44 = vrot.slane %v923_v39, 2  ;;  %v1056_v23 = vadd.f32 %v1055_v40, %v1054_v16 }
 0x181   : > { %v925_v30 = vadd.f32 %v924_v44, %v923_v39  ;;  %v1057_v48 = vrot.slane %v1056_v23, 2 }
 0x183   : > { %v926_v14 = vrot.slane %v925_v30, 1  ;;  %v1058_v49 = vadd.f32 %v1057_v48, %v1056_v23 }
 0x185   : > { %v1059_v15 = vrot.slane %v1058_v49, 1  ;;  %v927_v51 = vadd.f32 %v926_v14, %v925_v30 }
 0x187   : > { %v1060_v21 = vadd.f32 %v1059_v15, %v1058_v49 }
 0x189   : > { %v1062_v27 = vsel %vm1061_vm0, %v927_v51, %v1060_v21 }
 0x18a   : > { %v1064_v53 = vsel %vm1063_vm1, %v1062_v27, 0.0 }
 0x18b   : > { %1065 = vst [vmem:[%s184_s17] sm:$0xff] %v1064_v53 }
 0x18c PF: > { %s14_s12 = sadd.s32 1, %s1395_s12  }
 0x18d   : > { %p11_p5 = scmp.ge.s32.totalorder %s14_s12, 4  }
 0x18f   :  { %13 = sbr.rel (!%p11_p5) target bundleno = 1 (0x1), region = 70 }

// kernel: basic_conv_forward.3
= control target key start
LH: loop header
LB: loop body
LE: loop exit
PB: predicated region body
PF: predicated region fallthrough
CT: control target
= control target key end

     0   :  { %s613_s12 = smov 0   ;;  %s900_s0 = inlined_call_operand.vmem [shape: f32[1024,128], index: 0, kind: input, shape index: {}]   ;;  %s901_s1 = inlined_call_operand.vmem [shape: f32[1,128], index: 1, kind: input, shape index: {}]   ;;  %s902_s2 = inlined_call_operand.vmem [shape: f32[1,128], index: 2, kind: input, shape index: {}]   ;;  %s903_s3 = inlined_call_operand.vmem [shape: f32[1024,128], index: 3, kind: output, shape index: {}]  }
   0x1 LB: > { %s564_s13 = sadd.s32 4294967295, %s591_s12   ;;  %p568_p0 = scmp.ge.s32.totalorder %s591_s12, 1  ;;  %s591_s12 = sphi %s613_s12, %s13_s12  }
   0x2   : > { %p138_p1 = scmp.lt.s32.totalorder %s591_s12, 3 }
   0x4   : > { %p139_p2 = pnand %p568_p0, %p138_p1 }
   0x5   : > { %s569_s14 = sshll.u32 (!%p139_p2), %s564_s13, 6  ;;  %v624_v0 = vld [vmem:[%s901_s1] ss:$0 sm:$0xff] (!%p139_p2) }
   0x6   : > { %142 = sbr.rel (%p139_p2) target bundleno = 70 (0x46), region = 32  ;;  %p163_p3 = scmp.lt.s32.totalorder (!%p139_p2), %s569_s14, 127  ;;  %v634_v1 = vld [vmem:[%s902_s2] ss:$0 sm:$0xff] (!%p139_p2) }
   0xd   : > { %s905_s14 = smov (!%p163_p3, %s569_s14), 127 }
   0xe   : > { %s570_s15 = sshll.u32 %s905_s14, 3 }
   0xf   : > { %s629_s20 = scalar_lea.vmem %s900_s0, %s570_s15  ;;  %s657_s25 = scalar_lea.vmem %s903_s3, %s570_s15 }
  0x10   : > { %v174_v2 = vld [vmem:[%s629_s20] sm:$0xff]  ;;  %v175_v3 = vld [vmem:[%s629_s20 + $0x8] sm:$0xff]  ;;  %v176_v4 = vld [vmem:[%s629_s20 + $0x10] sm:$0xff] }
  0x11   : > { %v245_v5 = vmul.f32 %v624_v0, %v174_v2  ;;  %v246_v6 = vmul.f32 %v624_v0, %v175_v3  ;;  %v247_v7 = vmul.f32 %v624_v0, %v176_v4  ;;  %v177_v8 = vld [vmem:[%s629_s20 + $0x18] sm:$0xff]  ;;  %v178_v9 = vld [vmem:[%s629_s20 + $0x20] sm:$0xff]  ;;  %v179_v10 = vld [vmem:[%s629_s20 + $0x28] sm:$0xff] }
  0x12   : > { %v248_v11 = vmul.f32 %v624_v0, %v177_v8  ;;  %v249_v12 = vmul.f32 %v624_v0, %v178_v9  ;;  %v250_v13 = vmul.f32 %v624_v0, %v179_v10  ;;  %v180_v14 = vld [vmem:[%s629_s20 + $0x30] sm:$0xff]  ;;  %v181_v15 = vld [vmem:[%s629_s20 + $0x38] sm:$0xff]  ;;  %v182_v24 = vld [vmem:[%s629_s20 + $0x40] sm:$0xff] }
  0x13   : > { %v316_v16 = vadd.f32 %v634_v1, %v245_v5  ;;  %v317_v17 = vadd.f32 %v634_v1, %v246_v6  ;;  %v318_v18 = vadd.f32 %v634_v1, %v247_v7  ;;  %v251_v19 = vmul.f32 %v624_v0, %v180_v14  ;;  %v183_v25 = vld [vmem:[%s629_s20 + $0x48] sm:$0xff]  ;;  %v184_v26 = vld [vmem:[%s629_s20 + $0x50] sm:$0xff]  ;;  %v185_v31 = vld [vmem:[%s629_s20 + $0x58] sm:$0xff] }
  0x14   : > { %v319_v20 = vadd.f32 %v634_v1, %v248_v11  ;;  %v320_v21 = vadd.f32 %v634_v1, %v249_v12  ;;  %v321_v22 = vadd.f32 %v634_v1, %v250_v13  ;;  %v252_v23 = vmul.f32 %v624_v0, %v181_v15  ;;  %v186_v32 = vld [vmem:[%s629_s20 + $0x60] sm:$0xff]  ;;  %v187_v33 = vld [vmem:[%s629_s20 + $0x68] sm:$0xff]  ;;  %v188_v38 = vld [vmem:[%s629_s20 + $0x70] sm:$0xff] }
  0x15   : > { %v380_v27 = vmax.f32 %v316_v16, 0.0  ;;  %v381_v28 = vmax.f32 %v317_v17, 0.0  ;;  %v382_v29 = vmax.f32 %v318_v18, 0.0  ;;  %v322_v30 = vadd.f32 %v634_v1, %v251_v19  ;;  %v189_v43 = vld [vmem:[%s629_s20 + $0x78] sm:$0xff]  ;;  %v190_v56 = vld [vmem:[%s629_s20 + $0x80] sm:$0xff]  ;;  %v191_v57 = vld [vmem:[%s629_s20 + $0x88] sm:$0xff] }
  0x16   : > { %v383_v34 = vmax.f32 %v319_v20, 0.0  ;;  %v384_v35 = vmax.f32 %v320_v21, 0.0  ;;  %v385_v36 = vmax.f32 %v321_v22, 0.0  ;;  %v323_v37 = vadd.f32 %v634_v1, %v252_v23  ;;  %v192_v58 = vld [vmem:[%s629_s20 + $0x90] sm:$0xff]  ;;  %v193_v63 = vld [vmem:[%s629_s20 + $0x98] sm:$0xff]  ;;  %v194_v2 = vld [vmem:[%s629_s20 + $0xa0] sm:$0xff] }
  0x17   : > { %444 = vst [vmem:[%s657_s25] sm:$0xff] %v380_v27  ;;  %445 = vst [vmem:[%s657_s25 + $0x8] sm:$0xff] %v381_v28  ;;  %v386_v39 = vmax.f32 %v322_v30, 0.0  ;;  %v253_v40 = vmul.f32 %v624_v0, %v182_v24  ;;  %v254_v41 = vmul.f32 %v624_v0, %v183_v25  ;;  %v255_v42 = vmul.f32 %v624_v0, %v184_v26  ;;  %v195_v3 = vld [vmem:[%s629_s20 + $0xa8] sm:$0xff]  ;;  %v196_v8 = vld [vmem:[%s629_s20 + $0xb0] sm:$0xff] }
  0x18   : > { %446 = vst [vmem:[%s657_s25 + $0x10] sm:$0xff] %v382_v29  ;;  %447 = vst [vmem:[%s657_s25 + $0x18] sm:$0xff] %v383_v34  ;;  %v387_v44 = vmax.f32 %v323_v37, 0.0  ;;  %v256_v45 = vmul.f32 %v624_v0, %v185_v31  ;;  %v257_v46 = vmul.f32 %v624_v0, %v186_v32  ;;  %v258_v47 = vmul.f32 %v624_v0, %v187_v33  ;;  %v197_v13 = vld [vmem:[%s629_s20 + $0xb8] sm:$0xff]  ;;  %v198_v26 = vld [vmem:[%s629_s20 + $0xc0] sm:$0xff] }
  0x19   : > { %448 = vst [vmem:[%s657_s25 + $0x20] sm:$0xff] %v384_v35  ;;  %449 = vst [vmem:[%s657_s25 + $0x28] sm:$0xff] %v385_v36  ;;  %v324_v48 = vadd.f32 %v634_v1, %v253_v40  ;;  %v325_v49 = vadd.f32 %v634_v1, %v254_v41  ;;  %v326_v50 = vadd.f32 %v634_v1, %v255_v42  ;;  %v199_v27 = vld [vmem:[%s629_s20 + $0xc8] sm:$0xff]  ;;  %v200_v28 = vld [vmem:[%s629_s20 + $0xd0] sm:$0xff] }
  0x1a   : > { %450 = vst [vmem:[%s657_s25 + $0x30] sm:$0xff] %v386_v39  ;;  %v259_v51 = vmul.f32 %v624_v0, %v188_v38  ;;  %451 = vst [vmem:[%s657_s25 + $0x38] sm:$0xff] %v387_v44  ;;  %v327_v52 = vadd.f32 %v634_v1, %v256_v45  ;;  %v328_v53 = vadd.f32 %v634_v1, %v257_v46  ;;  %v201_v33 = vld [vmem:[%s629_s20 + $0xd8] sm:$0xff]  ;;  %v202_v34 = vld [vmem:[%s629_s20 + $0xe0] sm:$0xff] }
  0x1b   : > { %v329_v54 = vadd.f32 %v634_v1, %v258_v47  ;;  %v260_v55 = vmul.f32 %v624_v0, %v189_v43  ;;  %v388_v59 = vmax.f32 %v324_v48, 0.0  ;;  %v389_v60 = vmax.f32 %v325_v49, 0.0  ;;  %v203_v35 = vld [vmem:[%s629_s20 + $0xe8] sm:$0xff]  ;;  %v204_v40 = vld [vmem:[%s629_s20 + $0xf0] sm:$0xff]  ;;  %v205_v45 = vld [vmem:[%s629_s20 + $0xf8] sm:$0xff] }
  0x1c   : > { %v390_v61 = vmax.f32 %v326_v50, 0.0  ;;  %v330_v62 = vadd.f32 %v634_v1, %v259_v51  ;;  %v391_v4 = vmax.f32 %v327_v52, 0.0  ;;  %v392_v5 = vmax.f32 %v328_v53, 0.0 }
  0x1d   : > { %v393_v6 = vmax.f32 %v329_v54, 0.0  ;;  %v331_v7 = vadd.f32 %v634_v1, %v260_v55  ;;  %452 = vst [vmem:[%s657_s25 + $0x40] sm:$0xff] %v388_v59  ;;  %453 = vst [vmem:[%s657_s25 + $0x48] sm:$0xff] %v389_v60  ;;  %v261_v10 = vmul.f32 %v624_v0, %v190_v56  ;;  %v262_v11 = vmul.f32 %v624_v0, %v191_v57  ;;  %v207_v59 = vld [vmem:[%s629_s20 + $0x108] sm:$0xff]  ;;  %v208_v60 = vld [vmem:[%s629_s20 + $0x110] sm:$0xff] }
  0x1e   : > { %454 = vst [vmem:[%s657_s25 + $0x50] sm:$0xff] %v390_v61  ;;  %v394_v9 = vmax.f32 %v330_v62, 0.0  ;;  %v263_v12 = vmul.f32 %v624_v0, %v192_v58  ;;  %455 = vst [vmem:[%s657_s25 + $0x58] sm:$0xff] %v391_v4  ;;  %v264_v15 = vmul.f32 %v624_v0, %v193_v63  ;;  %v265_v16 = vmul.f32 %v624_v0, %v194_v2  ;;  %v206_v58 = vld [vmem:[%s629_s20 + $0x100] sm:$0xff] }
  0x1f   : > { %456 = vst [vmem:[%s657_s25 + $0x60] sm:$0xff] %v392_v5  ;;  %457 = vst [vmem:[%s657_s25 + $0x68] sm:$0xff] %v393_v6  ;;  %v395_v14 = vmax.f32 %v331_v7, 0.0  ;;  %v266_v17 = vmul.f32 %v624_v0, %v195_v3  ;;  %v332_v18 = vadd.f32 %v634_v1, %v261_v10  ;;  %v333_v19 = vadd.f32 %v634_v1, %v262_v11  ;;  %v209_v3 = vld [vmem:[%s629_s20 + $0x118] sm:$0xff]  ;;  %v210_v4 = vld [vmem:[%s629_s20 + $0x120] sm:$0xff] }
  0x20   : > { %458 = vst [vmem:[%s657_s25 + $0x70] sm:$0xff] %v394_v9  ;;  %v334_v20 = vadd.f32 %v634_v1, %v263_v12  ;;  %v267_v21 = vmul.f32 %v624_v0, %v196_v8  ;;  %v335_v22 = vadd.f32 %v634_v1, %v264_v15  ;;  %v336_v23 = vadd.f32 %v634_v1, %v265_v16  ;;  %v211_v5 = vld [vmem:[%s629_s20 + $0x128] sm:$0xff]  ;;  %v212_v10 = vld [vmem:[%s629_s20 + $0x130] sm:$0xff]  ;;  %v213_v15 = vld [vmem:[%s629_s20 + $0x138] sm:$0xff] }
  0x21   : > { %459 = vst [vmem:[%s657_s25 + $0x78] sm:$0xff] %v395_v14  ;;  %v337_v24 = vadd.f32 %v634_v1, %v266_v17  ;;  %v268_v25 = vmul.f32 %v624_v0, %v197_v13  ;;  %v396_v29 = vmax.f32 %v332_v18, 0.0  ;;  %v397_v30 = vmax.f32 %v333_v19, 0.0 }
  0x22   : > { %v398_v31 = vmax.f32 %v334_v20, 0.0  ;;  %v338_v32 = vadd.f32 %v634_v1, %v267_v21  ;;  %v399_v36 = vmax.f32 %v335_v22, 0.0  ;;  %v400_v37 = vmax.f32 %v336_v23, 0.0 }
  0x23   : > { %v401_v38 = vmax.f32 %v337_v24, 0.0  ;;  %v339_v39 = vadd.f32 %v634_v1, %v268_v25  ;;  %460 = vst [vmem:[%s657_s25 + $0x80] sm:$0xff] %v396_v29  ;;  %461 = vst [vmem:[%s657_s25 + $0x88] sm:$0xff] %v397_v30  ;;  %v269_v42 = vmul.f32 %v624_v0, %v198_v26  ;;  %v270_v43 = vmul.f32 %v624_v0, %v199_v27  ;;  %v215_v29 = vld [vmem:[%s629_s20 + $0x148] sm:$0xff]  ;;  %v216_v30 = vld [vmem:[%s629_s20 + $0x150] sm:$0xff] }
  0x24   : > { %462 = vst [vmem:[%s657_s25 + $0x90] sm:$0xff] %v398_v31  ;;  %v402_v41 = vmax.f32 %v338_v32, 0.0  ;;  %v271_v44 = vmul.f32 %v624_v0, %v200_v28  ;;  %463 = vst [vmem:[%s657_s25 + $0x98] sm:$0xff] %v399_v36  ;;  %v272_v47 = vmul.f32 %v624_v0, %v201_v33  ;;  %v273_v48 = vmul.f32 %v624_v0, %v202_v34  ;;  %v214_v28 = vld [vmem:[%s629_s20 + $0x140] sm:$0xff] }
  0x25   : > { %464 = vst [vmem:[%s657_s25 + $0xa0] sm:$0xff] %v400_v37  ;;  %465 = vst [vmem:[%s657_s25 + $0xa8] sm:$0xff] %v401_v38  ;;  %v403_v46 = vmax.f32 %v339_v39, 0.0  ;;  %v274_v49 = vmul.f32 %v624_v0, %v203_v35  ;;  %v340_v50 = vadd.f32 %v634_v1, %v269_v42  ;;  %v341_v51 = vadd.f32 %v634_v1, %v270_v43  ;;  %v217_v35 = vld [vmem:[%s629_s20 + $0x158] sm:$0xff]  ;;  %v218_v36 = vld [vmem:[%s629_s20 + $0x160] sm:$0xff] }
  0x26   : > { %466 = vst [vmem:[%s657_s25 + $0xb0] sm:$0xff] %v402_v41  ;;  %v342_v52 = vadd.f32 %v634_v1, %v271_v44  ;;  %v275_v53 = vmul.f32 %v624_v0, %v204_v40  ;;  %v343_v54 = vadd.f32 %v634_v1, %v272_v47  ;;  %v344_v55 = vadd.f32 %v634_v1, %v273_v48  ;;  %v219_v37 = vld [vmem:[%s629_s20 + $0x168] sm:$0xff]  ;;  %v220_v42 = vld [vmem:[%s629_s20 + $0x170] sm:$0xff]  ;;  %v221_v47 = vld [vmem:[%s629_s20 + $0x178] sm:$0xff] }
  0x27   : > { %467 = vst [vmem:[%s657_s25 + $0xb8] sm:$0xff] %v403_v46  ;;  %v345_v56 = vadd.f32 %v634_v1, %v274_v49  ;;  %v276_v57 = vmul.f32 %v624_v0, %v205_v45  ;;  %v404_v61 = vmax.f32 %v340_v50, 0.0  ;;  %v405_v62 = vmax.f32 %v341_v51, 0.0 }
  0x28   : > { %v406_v63 = vmax.f32 %v342_v52, 0.0  ;;  %v346_v2 = vadd.f32 %v634_v1, %v275_v53  ;;  %v407_v6 = vmax.f32 %v343_v54, 0.0  ;;  %v408_v7 = vmax.f32 %v344_v55, 0.0 }
  0x29   : > { %v409_v8 = vmax.f32 %v345_v56, 0.0  ;;  %v347_v9 = vadd.f32 %v634_v1, %v276_v57  ;;  %468 = vst [vmem:[%s657_s25 + $0xc0] sm:$0xff] %v404_v61  ;;  %469 = vst [vmem:[%s657_s25 + $0xc8] sm:$0xff] %v405_v62  ;;  %v277_v12 = vmul.f32 %v624_v0, %v206_v58  ;;  %v278_v13 = vmul.f32 %v624_v0, %v207_v59  ;;  %v223_v61 = vld [vmem:[%s629_s20 + $0x188] sm:$0xff]  ;;  %v224_v62 = vld [vmem:[%s629_s20 + $0x190] sm:$0xff] }
  0x2a   : > { %470 = vst [vmem:[%s657_s25 + $0xd0] sm:$0xff] %v406_v63  ;;  %v410_v11 = vmax.f32 %v346_v2, 0.0  ;;  %v279_v14 = vmul.f32 %v624_v0, %v208_v60  ;;  %471 = vst [vmem:[%s657_s25 + $0xd8] sm:$0xff] %v407_v6  ;;  %v280_v17 = vmul.f32 %v624_v0, %v209_v3  ;;  %v281_v18 = vmul.f32 %v624_v0, %v210_v4  ;;  %v222_v60 = vld [vmem:[%s629_s20 + $0x180] sm:$0xff] }
  0x2b   : > { %472 = vst [vmem:[%s657_s25 + $0xe0] sm:$0xff] %v408_v7  ;;  %473 = vst [vmem:[%s657_s25 + $0xe8] sm:$0xff] %v409_v8  ;;  %v411_v16 = vmax.f32 %v347_v9, 0.0  ;;  %v282_v19 = vmul.f32 %v624_v0, %v211_v5  ;;  %v348_v20 = vadd.f32 %v634_v1, %v277_v12  ;;  %v349_v21 = vadd.f32 %v634_v1, %v278_v13  ;;  %v225_v5 = vld [vmem:[%s629_s20 + $0x198] sm:$0xff]  ;;  %v226_v6 = vld [vmem:[%s629_s20 + $0x1a0] sm:$0xff] }
  0x2c   : > { %474 = vst [vmem:[%s657_s25 + $0xf0] sm:$0xff] %v410_v11  ;;  %v350_v22 = vadd.f32 %v634_v1, %v279_v14  ;;  %v283_v23 = vmul.f32 %v624_v0, %v212_v10  ;;  %v351_v24 = vadd.f32 %v634_v1, %v280_v17  ;;  %v352_v25 = vadd.f32 %v634_v1, %v281_v18  ;;  %v227_v7 = vld [vmem:[%s629_s20 + $0x1a8] sm:$0xff]  ;;  %v228_v12 = vld [vmem:[%s629_s20 + $0x1b0] sm:$0xff]  ;;  %v229_v17 = vld [vmem:[%s629_s20 + $0x1b8] sm:$0xff] }
  0x2d   : > { %475 = vst [vmem:[%s657_s25 + $0xf8] sm:$0xff] %v411_v16  ;;  %v353_v26 = vadd.f32 %v634_v1, %v282_v19  ;;  %v284_v27 = vmul.f32 %v624_v0, %v213_v15  ;;  %v412_v31 = vmax.f32 %v348_v20, 0.0  ;;  %v413_v32 = vmax.f32 %v349_v21, 0.0 }
  0x2e   : > { %v414_v33 = vmax.f32 %v350_v22, 0.0  ;;  %v354_v34 = vadd.f32 %v634_v1, %v283_v23  ;;  %v415_v38 = vmax.f32 %v351_v24, 0.0  ;;  %v416_v39 = vmax.f32 %v352_v25, 0.0 }
  0x2f   : > { %v417_v40 = vmax.f32 %v353_v26, 0.0  ;;  %v355_v41 = vadd.f32 %v634_v1, %v284_v27  ;;  %476 = vst [vmem:[%s657_s25 + $0x100] sm:$0xff] %v412_v31  ;;  %477 = vst [vmem:[%s657_s25 + $0x108] sm:$0xff] %v413_v32  ;;  %v285_v44 = vmul.f32 %v624_v0, %v214_v28  ;;  %v286_v45 = vmul.f32 %v624_v0, %v215_v29  ;;  %v231_v31 = vld [vmem:[%s629_s20 + $0x1c8] sm:$0xff]  ;;  %v232_v32 = vld [vmem:[%s629_s20 + $0x1d0] sm:$0xff] }
  0x30   : > { %478 = vst [vmem:[%s657_s25 + $0x110] sm:$0xff] %v414_v33  ;;  %v418_v43 = vmax.f32 %v354_v34, 0.0  ;;  %v287_v46 = vmul.f32 %v624_v0, %v216_v30  ;;  %479 = vst [vmem:[%s657_s25 + $0x118] sm:$0xff] %v415_v38  ;;  %v288_v49 = vmul.f32 %v624_v0, %v217_v35  ;;  %v289_v50 = vmul.f32 %v624_v0, %v218_v36  ;;  %v230_v30 = vld [vmem:[%s629_s20 + $0x1c0] sm:$0xff] }
  0x31   : > { %480 = vst [vmem:[%s657_s25 + $0x120] sm:$0xff] %v416_v39  ;;  %481 = vst [vmem:[%s657_s25 + $0x128] sm:$0xff] %v417_v40  ;;  %v419_v48 = vmax.f32 %v355_v41, 0.0  ;;  %v290_v51 = vmul.f32 %v624_v0, %v219_v37  ;;  %v356_v52 = vadd.f32 %v634_v1, %v285_v44  ;;  %v357_v53 = vadd.f32 %v634_v1, %v286_v45  ;;  %v233_v37 = vld [vmem:[%s629_s20 + $0x1d8] sm:$0xff]  ;;  %v234_v38 = vld [vmem:[%s629_s20 + $0x1e0] sm:$0xff] }
  0x32   : > { %482 = vst [vmem:[%s657_s25 + $0x130] sm:$0xff] %v418_v43  ;;  %v358_v54 = vadd.f32 %v634_v1, %v287_v46  ;;  %v291_v55 = vmul.f32 %v624_v0, %v220_v42  ;;  %v359_v56 = vadd.f32 %v634_v1, %v288_v49  ;;  %v360_v57 = vadd.f32 %v634_v1, %v289_v50  ;;  %v235_v39 = vld [vmem:[%s629_s20 + $0x1e8] sm:$0xff]  ;;  %v236_v44 = vld [vmem:[%s629_s20 + $0x1f0] sm:$0xff]  ;;  %v237_v49 = vld [vmem:[%s629_s20 + $0x1f8] sm:$0xff] }
  0x33   : > { %483 = vst [vmem:[%s657_s25 + $0x138] sm:$0xff] %v419_v48  ;;  %v361_v58 = vadd.f32 %v634_v1, %v290_v51  ;;  %v292_v59 = vmul.f32 %v624_v0, %v221_v47  ;;  %v420_v63 = vmax.f32 %v356_v52, 0.0  ;;  %v421_v2 = vmax.f32 %v357_v53, 0.0 }
  0x34   : > { %v422_v3 = vmax.f32 %v358_v54, 0.0  ;;  %v362_v4 = vadd.f32 %v634_v1, %v291_v55  ;;  %v423_v8 = vmax.f32 %v359_v56, 0.0  ;;  %v424_v9 = vmax.f32 %v360_v57, 0.0 }
  0x35   : > { %v425_v10 = vmax.f32 %v361_v58, 0.0  ;;  %v363_v11 = vadd.f32 %v634_v1, %v292_v59  ;;  %484 = vst [vmem:[%s657_s25 + $0x140] sm:$0xff] %v420_v63  ;;  %485 = vst [vmem:[%s657_s25 + $0x148] sm:$0xff] %v421_v2  ;;  %v293_v14 = vmul.f32 %v624_v0, %v222_v60  ;;  %v294_v15 = vmul.f32 %v624_v0, %v223_v61 }
  0x36   : > { %486 = vst [vmem:[%s657_s25 + $0x150] sm:$0xff] %v422_v3  ;;  %v426_v13 = vmax.f32 %v362_v4, 0.0  ;;  %v295_v16 = vmul.f32 %v624_v0, %v224_v62  ;;  %487 = vst [vmem:[%s657_s25 + $0x158] sm:$0xff] %v423_v8  ;;  %v296_v19 = vmul.f32 %v624_v0, %v225_v5  ;;  %v297_v20 = vmul.f32 %v624_v0, %v226_v6 }
  0x37   : > { %488 = vst [vmem:[%s657_s25 + $0x160] sm:$0xff] %v424_v9  ;;  %489 = vst [vmem:[%s657_s25 + $0x168] sm:$0xff] %v425_v10  ;;  %v427_v18 = vmax.f32 %v363_v11, 0.0  ;;  %v298_v21 = vmul.f32 %v624_v0, %v227_v7  ;;  %v364_v22 = vadd.f32 %v634_v1, %v293_v14  ;;  %v365_v23 = vadd.f32 %v634_v1, %v294_v15 }
  0x38   : > { %490 = vst [vmem:[%s657_s25 + $0x170] sm:$0xff] %v426_v13  ;;  %v366_v24 = vadd.f32 %v634_v1, %v295_v16  ;;  %v299_v25 = vmul.f32 %v624_v0, %v228_v12  ;;  %v367_v26 = vadd.f32 %v634_v1, %v296_v19  ;;  %v368_v27 = vadd.f32 %v634_v1, %v297_v20 }
  0x39   : > { %491 = vst [vmem:[%s657_s25 + $0x178] sm:$0xff] %v427_v18  ;;  %v369_v28 = vadd.f32 %v634_v1, %v298_v21  ;;  %v300_v29 = vmul.f32 %v624_v0, %v229_v17  ;;  %v428_v33 = vmax.f32 %v364_v22, 0.0  ;;  %v429_v34 = vmax.f32 %v365_v23, 0.0 }
  0x3a   : > { %v430_v35 = vmax.f32 %v366_v24, 0.0  ;;  %v370_v36 = vadd.f32 %v634_v1, %v299_v25  ;;  %v431_v40 = vmax.f32 %v367_v26, 0.0  ;;  %v432_v41 = vmax.f32 %v368_v27, 0.0 }
  0x3b   : > { %v433_v42 = vmax.f32 %v369_v28, 0.0  ;;  %v371_v43 = vadd.f32 %v634_v1, %v300_v29  ;;  %492 = vst [vmem:[%s657_s25 + $0x180] sm:$0xff] %v428_v33  ;;  %493 = vst [vmem:[%s657_s25 + $0x188] sm:$0xff] %v429_v34  ;;  %v301_v46 = vmul.f32 %v624_v0, %v230_v30  ;;  %v302_v47 = vmul.f32 %v624_v0, %v231_v31 }
  0x3c   : > { %494 = vst [vmem:[%s657_s25 + $0x190] sm:$0xff] %v430_v35  ;;  %v434_v45 = vmax.f32 %v370_v36, 0.0  ;;  %v303_v48 = vmul.f32 %v624_v0, %v232_v32  ;;  %495 = vst [vmem:[%s657_s25 + $0x198] sm:$0xff] %v431_v40  ;;  %v304_v51 = vmul.f32 %v624_v0, %v233_v37  ;;  %v305_v52 = vmul.f32 %v624_v0, %v234_v38 }
  0x3d   : > { %496 = vst [vmem:[%s657_s25 + $0x1a0] sm:$0xff] %v432_v41  ;;  %497 = vst [vmem:[%s657_s25 + $0x1a8] sm:$0xff] %v433_v42  ;;  %v435_v50 = vmax.f32 %v371_v43, 0.0  ;;  %v306_v53 = vmul.f32 %v624_v0, %v235_v39  ;;  %v372_v54 = vadd.f32 %v634_v1, %v301_v46  ;;  %v373_v55 = vadd.f32 %v634_v1, %v302_v47 }
  0x3e   : > { %498 = vst [vmem:[%s657_s25 + $0x1b0] sm:$0xff] %v434_v45  ;;  %v374_v56 = vadd.f32 %v634_v1, %v303_v48  ;;  %v307_v57 = vmul.f32 %v624_v0, %v236_v44  ;;  %v375_v58 = vadd.f32 %v634_v1, %v304_v51  ;;  %v376_v59 = vadd.f32 %v634_v1, %v305_v52 }
  0x3f   : > { %499 = vst [vmem:[%s657_s25 + $0x1b8] sm:$0xff] %v435_v50  ;;  %v377_v60 = vadd.f32 %v634_v1, %v306_v53  ;;  %v308_v61 = vmul.f32 %v624_v0, %v237_v49  ;;  %v436_v62 = vmax.f32 %v372_v54, 0.0  ;;  %v437_v63 = vmax.f32 %v373_v55, 0.0 }
  0x40   : > { %v438_v2 = vmax.f32 %v374_v56, 0.0  ;;  %v378_v3 = vadd.f32 %v634_v1, %v307_v57  ;;  %v439_v4 = vmax.f32 %v375_v58, 0.0  ;;  %v440_v5 = vmax.f32 %v376_v59, 0.0 }
  0x41   : > { %v441_v6 = vmax.f32 %v377_v60, 0.0  ;;  %v379_v7 = vadd.f32 %v634_v1, %v308_v61  ;;  %500 = vst [vmem:[%s657_s25 + $0x1c0] sm:$0xff] %v436_v62  ;;  %501 = vst [vmem:[%s657_s25 + $0x1c8] sm:$0xff] %v437_v63 }
  0x42   : > { %502 = vst [vmem:[%s657_s25 + $0x1d0] sm:$0xff] %v438_v2  ;;  %v442_v8 = vmax.f32 %v378_v3, 0.0  ;;  %503 = vst [vmem:[%s657_s25 + $0x1d8] sm:$0xff] %v439_v4 }
  0x43   : > { %504 = vst [vmem:[%s657_s25 + $0x1e0] sm:$0xff] %v440_v5  ;;  %505 = vst [vmem:[%s657_s25 + $0x1e8] sm:$0xff] %v441_v6  ;;  %v443_v0 = vmax.f32 %v379_v7, 0.0 }
  0x44   : > { %506 = vst [vmem:[%s657_s25 + $0x1f0] sm:$0xff] %v442_v8 }
  0x45   : > { %507 = vst [vmem:[%s657_s25 + $0x1f8] sm:$0xff] %v443_v0 }
  0x46 PF: > { %s13_s12 = sadd.s32 1, %s591_s12  }
  0x47   : > { %p10_p4 = scmp.ge.s32.totalorder %s13_s12, 4  }
  0x49   :  { %12 = sbr.rel (!%p10_p4) target bundleno = 1 (0x1), region = 62 }

</bundles_post_ra>
